<compile_context>
chip_gen: v5e
topology: v5e:2x2
jax: 0.10.0
libtpu: 0.0.40
codegen_flags: <defaults>
</compile_context>

<pallas_src>
import jax
import jax.numpy as jnp
from jax.experimental import pallas as pl
from jax.experimental.pallas import tpu as pltpu


INPUT_DIM = 17
HIDDEN_DIM = 256
NUM_STYLES = 3
HEAD_PAD = 128           # lane-dense head / output width
MAX_TILE_B = 1024        # batch rows per grid step (sweep 512-2048)
LN_EPS = 1e-5
NEG_BIG = -1e9           # bias for padded logit columns -> exp() underflows to 0


def _pick_vmem_limit():
    """Generation-aware scoped-VMEM limit: ~75% of per-core VMEM, <=96 MiB.

    v5e/v6e (128 MiB physical) -> 96 MiB; v7x (64 MiB physical) -> 48 MiB.
    """
    try:
        cap = pltpu.get_tpu_info().vmem_capacity_bytes
    except Exception:
        cap = 64 * 1024 * 1024
    return int(min(96 * 1024 * 1024, cap * 3 // 4))


_VMEM_LIMIT_BYTES = _pick_vmem_limit()


def _round_up(n, m):
    return ((n + m - 1) // m) * m


def _choose_tile_b(batch):
    """Pick the batch tile: whole batch for small inputs (rounded to 16 rows
    for bf16 sublane packing), otherwise <= MAX_TILE_B with an even grid
    length so dimension_semantics=('parallel',) can shard across v7x's 2 TCs."""
    b16 = _round_up(max(batch, 1), 16)
    if b16 <= MAX_TILE_B:
        return b16
    n_tiles = pl.cdiv(b16, MAX_TILE_B)
    if n_tiles % 2:
        n_tiles += 1                      # even grid -> dual-TC friendly (v7x)
    return _round_up(pl.cdiv(b16, n_tiles), 16)


def _layernorm(h):
    # nn.LayerNorm(hidden_dim), default affine gamma=1, beta=0 (f32 math).
    # Single data pass: var = E[h^2] - mu^2 (clamped against cancellation).
    mu = jnp.mean(h, axis=-1, keepdims=True)
    ms = jnp.mean(h * h, axis=-1, keepdims=True)
    var = jnp.maximum(ms - mu * mu, 0.0)
    return (h - mu) * jax.lax.rsqrt(var + LN_EPS)


def meta_strategy_kernel(x_ref, w1_ref, b1_ref, w2_ref, b2_ref,
                         w3_ref, b3_ref, wh_ref, bh_ref, out_ref):
    # MXU operands in bf16, f32 accumulation; elementwise math in f32.
    x = x_ref[...].astype(jnp.bfloat16)

    # h1 = dropout(norm1(relu(fc1(x))))            (dropout == identity, eval)
    z1 = jnp.dot(x, w1_ref[...], preferred_element_type=jnp.float32) + b1_ref[...]
    h1 = _layernorm(jnp.maximum(z1, 0.0))

    # h2 = dropout(norm2(relu(fc2(h1)))) + h1
    z2 = jnp.dot(h1.astype(jnp.bfloat16), w2_ref[...],
                 preferred_element_type=jnp.float32) + b2_ref[...]
    h2 = _layernorm(jnp.maximum(z2, 0.0)) + h1

    # h3 = dropout(norm3(relu(fc3(h2)))) + h2
    z3 = jnp.dot(h2.astype(jnp.bfloat16), w3_ref[...],
                 preferred_element_type=jnp.float32) + b3_ref[...]
    h3 = _layernorm(jnp.maximum(z3, 0.0)) + h2

    # style_logits over a lane-dense 128-wide head (padded columns carry a
    # -1e9 bias so they contribute exp(..)==0 to the softmax sum).
    logits = jnp.dot(h3.astype(jnp.bfloat16), wh_ref[...],
                     preferred_element_type=jnp.float32) + bh_ref[...]
    m = jnp.max(logits, axis=-1, keepdims=True)
    e = jnp.exp(logits - m)
    inv = pl.reciprocal(jnp.sum(e, axis=-1, keepdims=True), approx=True)
    out_ref[...] = (e * inv).astype(out_ref.dtype)


def prepare_params(params):
    """One-time weight prep, hoisted out of the per-call forward:
    bf16 MXU weights, f32 biases, head padded to 128 lanes (NEG_BIG bias on
    the padded columns)."""
    pad = HEAD_PAD - NUM_STYLES
    return {
        "w1": params["w1"].astype(jnp.bfloat16),
        "b1": params["b1"].astype(jnp.float32),
        "w2": params["w2"].astype(jnp.bfloat16),
        "b2": params["b2"].astype(jnp.float32),
        "w3": params["w3"].astype(jnp.bfloat16),
        "b3": params["b3"].astype(jnp.float32),
        "wh": jnp.pad(params["wh"], ((0, 0), (0, pad))).astype(jnp.bfloat16),
        "bh": jnp.pad(params["bh"], ((0, 0), (0, pad)),
                      constant_values=NEG_BIG).astype(jnp.float32),
    }


@jax.jit
def meta_strategy_forward(x, prepped):
    batch = x.shape[0]
    tile_b = _choose_tile_b(batch)
    grid = (pl.cdiv(batch, tile_b),)

    x_spec = pl.BlockSpec((tile_b, INPUT_DIM), lambda i: (i, 0))
    out_spec = pl.BlockSpec((tile_b, HEAD_PAD), lambda i: (i, 0))

    def const_spec(arr):
        # Weights/biases: constant index_map -> stay resident in VMEM.
        return pl.BlockSpec(arr.shape, lambda i: (0, 0))

    out = pl.pallas_call(
        meta_strategy_kernel,
        out_shape=jax.ShapeDtypeStruct((batch, HEAD_PAD), jnp.bfloat16),
        grid=grid,
        in_specs=[x_spec,
                  const_spec(prepped["w1"]), const_spec(prepped["b1"]),
                  const_spec(prepped["w2"]), const_spec(prepped["b2"]),
                  const_spec(prepped["w3"]), const_spec(prepped["b3"]),
                  const_spec(prepped["wh"]), const_spec(prepped["bh"])],
        out_specs=out_spec,
        compiler_params=pltpu.CompilerParams(
            dimension_semantics=("parallel",),
            vmem_limit_bytes=_VMEM_LIMIT_BYTES),
    )(x, prepped["w1"], prepped["b1"], prepped["w2"], prepped["b2"],
      prepped["w3"], prepped["b3"], prepped["wh"], prepped["bh"])

    # Padded softmax columns are exactly 0, so slicing == softmax over 3.
    # No padded rows exist (ragged last tile is masked on write).
    return out[:, :NUM_STYLES].astype(jnp.float32)


def xavier_uniform(key, fan_in, fan_out):
    bound = (6.0 / (fan_in + fan_out)) ** 0.5
    return jax.random.uniform(key, (fan_in, fan_out), jnp.float32, -bound, bound)


def init_params(key):
    k1, k2, k3, k4 = jax.random.split(key, 4)
    return {
        "w1": xavier_uniform(k1, INPUT_DIM, HIDDEN_DIM),
        "b1": jnp.zeros((1, HIDDEN_DIM), jnp.float32),
        "w2": xavier_uniform(k2, HIDDEN_DIM, HIDDEN_DIM),
        "b2": jnp.zeros((1, HIDDEN_DIM), jnp.float32),
        "w3": xavier_uniform(k3, HIDDEN_DIM, HIDDEN_DIM),
        "b3": jnp.zeros((1, HIDDEN_DIM), jnp.float32),
        "wh": xavier_uniform(k4, HIDDEN_DIM, NUM_STYLES),
        "bh": jnp.zeros((1, NUM_STYLES), jnp.float32),
    }


def build_input(features, strategy_metrics):
    """Plain-JAX glue mirroring the torch forward's concat / expand logic."""
    batch = features["volatility"].shape[0]
    market = jnp.concatenate(
        [features["volatility"].reshape(batch, 2),
         features["trend"].reshape(batch, 2),
         features["correlation_matrix"].reshape(batch, 4)], axis=1)
    if strategy_metrics.ndim == 1:
        strategy_metrics = strategy_metrics[None, :]
    if strategy_metrics.shape[0] != batch:
        strategy_metrics = jnp.broadcast_to(
            strategy_metrics, (batch, strategy_metrics.shape[1]))
    return jnp.concatenate([market, strategy_metrics], axis=1)


def reference_forward(x, params):
    """Pure f32 JAX reference (no bf16) for correctness checking."""
    def ln(h):
        mu = jnp.mean(h, axis=-1, keepdims=True)
        var = jnp.mean((h - mu) ** 2, axis=-1, keepdims=True)
        return (h - mu) / jnp.sqrt(var + LN_EPS)
    h1 = ln(jnp.maximum(x @ params["w1"] + params["b1"], 0.0))
    h2 = ln(jnp.maximum(h1 @ params["w2"] + params["b2"], 0.0)) + h1
    h3 = ln(jnp.maximum(h2 @ params["w3"] + params["b3"], 0.0)) + h2
    logits = h3 @ params["wh"] + params["bh"]
    return jax.nn.softmax(logits, axis=-1)


def _make_inputs(key, batch):
    kv, kt, kc, ks = jax.random.split(key, 4)
    features = {
        "volatility": jax.random.normal(kv, (batch, 2), jnp.float32),
        "trend": jax.random.normal(kt, (batch, 2), jnp.float32),
        "correlation_matrix": jax.random.normal(kc, (batch, 2, 2), jnp.float32),
    }
    # strategy_metrics as a 1-D vector (len 9) to exercise the
    # unsqueeze + expand path; total feature dim = 2 + 2 + 4 + 9 = 17.
    strategy_metrics = jax.random.normal(ks, (INPUT_DIM - 8,), jnp.float32)
    return build_input(features, strategy_metrics)


if __name__ == "__main__":
    key = jax.random.PRNGKey(0)
    kp, kin, kbig = jax.random.split(key, 3)

    params = init_params(kp)
    prepped = prepare_params(params)           # one-time, hoisted out of forward

    # --- small-batch check (batch=2, single ragged tile) ---
    batch = 2
    x = _make_inputs(kin, batch)                # (2, 17)
    style_weights = meta_strategy_forward(x, prepped)
    jax.block_until_ready(style_weights)

    ref = reference_forward(x, params)
    assert style_weights.shape == (batch, NUM_STYLES)
    # bf16 MXU operands + bf16 output + approx reciprocal => loosened tolerances.
    assert jnp.allclose(jnp.sum(style_weights, axis=-1), 1.0, atol=2e-2)
    assert jnp.allclose(style_weights, ref, atol=5e-2, rtol=5e-2)

    # --- larger-batch check (multi-tile grid + ragged last tile) ---
    big_batch = 2500
    xb = _make_inputs(kbig, big_batch)
    swb = meta_strategy_forward(xb, prepped)
    jax.block_until_ready(swb)
    refb = reference_forward(xb, params)
    assert swb.shape == (big_batch, NUM_STYLES)
    assert bool(jnp.all(jnp.isfinite(swb)))
    assert jnp.allclose(jnp.sum(swb, axis=-1), 1.0, atol=2e-2)
    assert jnp.allclose(swb, refb, atol=1e-1, rtol=5e-2)

    print("KERNEL_OK")
</pallas_src>

<mosaic_0001>
module attributes {stable_mosaic.version = 11 : i64} {
  func.func @meta_strategy_kernel(%arg0: i32, %arg1: memref<16x17xf32, #tpu.memory_space<vmem>>, %arg2: memref<17x256xbf16, #tpu.memory_space<vmem>>, %arg3: memref<1x256xf32, #tpu.memory_space<vmem>>, %arg4: memref<256x256xbf16, #tpu.memory_space<vmem>>, %arg5: memref<1x256xf32, #tpu.memory_space<vmem>>, %arg6: memref<256x256xbf16, #tpu.memory_space<vmem>>, %arg7: memref<1x256xf32, #tpu.memory_space<vmem>>, %arg8: memref<256x128xbf16, #tpu.memory_space<vmem>>, %arg9: memref<1x128xf32, #tpu.memory_space<vmem>>, %arg10: memref<16x128xbf16, #tpu.memory_space<vmem>>) attributes {dimension_semantics = [#tpu.dimension_semantics<parallel>], iteration_bounds = array<i64: 1>, scalar_prefetch = 0 : i64, scratch_operands = 0 : i64, tpu.core_type = #tpu.core_type<tc>, window_params = [{transform_indices = @transform_0, window_bounds = array<i64: 16, 17>}, {pipeline_mode = #tpu.pipeline_mode<synchronous>, transform_indices = @transform_1, window_bounds = array<i64: 17, 256>}, {pipeline_mode = #tpu.pipeline_mode<synchronous>, transform_indices = @transform_2, window_bounds = array<i64: 1, 256>}, {pipeline_mode = #tpu.pipeline_mode<synchronous>, transform_indices = @transform_3, window_bounds = array<i64: 256, 256>}, {pipeline_mode = #tpu.pipeline_mode<synchronous>, transform_indices = @transform_4, window_bounds = array<i64: 1, 256>}, {pipeline_mode = #tpu.pipeline_mode<synchronous>, transform_indices = @transform_5, window_bounds = array<i64: 256, 256>}, {pipeline_mode = #tpu.pipeline_mode<synchronous>, transform_indices = @transform_6, window_bounds = array<i64: 1, 256>}, {pipeline_mode = #tpu.pipeline_mode<synchronous>, transform_indices = @transform_7, window_bounds = array<i64: 256, 128>}, {pipeline_mode = #tpu.pipeline_mode<synchronous>, transform_indices = @transform_8, window_bounds = array<i64: 1, 128>}, {transform_indices = @transform_9, window_bounds = array<i64: 16, 128>}]} {
    %c0 = arith.constant 0 : index
    %c0_0 = arith.constant 0 : index
    %0 = vector.load %arg1[%c0, %c0_0] : memref<16x17xf32, #tpu.memory_space<vmem>>, vector<16x17xf32>
    %1 = arith.truncf %0 : vector<16x17xf32> to vector<16x17xbf16>
    %c0_1 = arith.constant 0 : index
    %c0_2 = arith.constant 0 : index
    %2 = vector.load %arg2[%c0_1, %c0_2] : memref<17x256xbf16, #tpu.memory_space<vmem>>, vector<17x256xbf16>
    %cst = arith.constant dense<0.000000e+00> : vector<16x256xf32>
    %3 = tpu.matmul %1, %2, %cst {dimension_numbers = #tpu.dot_dimension_numbers<[1], [0], [0], [1], [0, 0, 1, 1], [], []>} : vector<16x17xbf16>, vector<17x256xbf16>, vector<16x256xf32> -> vector<16x256xf32>
    %c0_3 = arith.constant 0 : index
    %c0_4 = arith.constant 0 : index
    %4 = vector.load %arg3[%c0_3, %c0_4] : memref<1x256xf32, #tpu.memory_space<vmem>>, vector<1x256xf32>
    %5 = vector.broadcast %4 : vector<1x256xf32> to vector<16x256xf32>
    %6 = arith.addf %3, %5 : vector<16x256xf32>
    %cst_5 = arith.constant 0.000000e+00 : f32
    %7 = vector.broadcast %cst_5 : f32 to vector<16x256xf32>
    %8 = arith.maximumf %6, %7 : vector<16x256xf32>
    %cst_6 = arith.constant dense<0.000000e+00> : vector<16xf32>
    %9 = vector.multi_reduction <add>, %8, %cst_6 [1] : vector<16x256xf32> to vector<16xf32>
    %10 = vector.shape_cast %9 : vector<16xf32> to vector<16x1xf32>
    %cst_7 = arith.constant 2.560000e+02 : f32
    %11 = vector.broadcast %cst_7 : f32 to vector<16x1xf32>
    %12 = arith.divf %10, %11 : vector<16x1xf32>
    %13 = arith.mulf %8, %8 : vector<16x256xf32>
    %cst_8 = arith.constant dense<0.000000e+00> : vector<16xf32>
    %14 = vector.multi_reduction <add>, %13, %cst_8 [1] : vector<16x256xf32> to vector<16xf32>
    %15 = vector.shape_cast %14 : vector<16xf32> to vector<16x1xf32>
    %cst_9 = arith.constant 2.560000e+02 : f32
    %16 = vector.broadcast %cst_9 : f32 to vector<16x1xf32>
    %17 = arith.divf %15, %16 : vector<16x1xf32>
    %18 = arith.mulf %12, %12 : vector<16x1xf32>
    %19 = arith.subf %17, %18 : vector<16x1xf32>
    %cst_10 = arith.constant 0.000000e+00 : f32
    %20 = vector.broadcast %cst_10 : f32 to vector<16x1xf32>
    %21 = arith.maximumf %19, %20 : vector<16x1xf32>
    %22 = vector.broadcast %12 : vector<16x1xf32> to vector<16x256xf32>
    %23 = arith.subf %8, %22 : vector<16x256xf32>
    %cst_11 = arith.constant 9.99999974E-6 : f32
    %24 = vector.broadcast %cst_11 : f32 to vector<16x1xf32>
    %25 = arith.addf %21, %24 : vector<16x1xf32>
    %26 = math.rsqrt %25 : vector<16x1xf32>
    %27 = vector.broadcast %26 : vector<16x1xf32> to vector<16x256xf32>
    %28 = arith.mulf %23, %27 : vector<16x256xf32>
    %29 = arith.truncf %28 : vector<16x256xf32> to vector<16x256xbf16>
    %c0_12 = arith.constant 0 : index
    %c0_13 = arith.constant 0 : index
    %30 = vector.load %arg4[%c0_12, %c0_13] : memref<256x256xbf16, #tpu.memory_space<vmem>>, vector<256x256xbf16>
    %cst_14 = arith.constant dense<0.000000e+00> : vector<16x256xf32>
    %31 = tpu.matmul %29, %30, %cst_14 {dimension_numbers = #tpu.dot_dimension_numbers<[1], [0], [0], [1], [0, 0, 1, 1], [], []>} : vector<16x256xbf16>, vector<256x256xbf16>, vector<16x256xf32> -> vector<16x256xf32>
    %c0_15 = arith.constant 0 : index
    %c0_16 = arith.constant 0 : index
    %32 = vector.load %arg5[%c0_15, %c0_16] : memref<1x256xf32, #tpu.memory_space<vmem>>, vector<1x256xf32>
    %33 = vector.broadcast %32 : vector<1x256xf32> to vector<16x256xf32>
    %34 = arith.addf %31, %33 : vector<16x256xf32>
    %cst_17 = arith.constant 0.000000e+00 : f32
    %35 = vector.broadcast %cst_17 : f32 to vector<16x256xf32>
    %36 = arith.maximumf %34, %35 : vector<16x256xf32>
    %cst_18 = arith.constant dense<0.000000e+00> : vector<16xf32>
    %37 = vector.multi_reduction <add>, %36, %cst_18 [1] : vector<16x256xf32> to vector<16xf32>
    %38 = vector.shape_cast %37 : vector<16xf32> to vector<16x1xf32>
    %cst_19 = arith.constant 2.560000e+02 : f32
    %39 = vector.broadcast %cst_19 : f32 to vector<16x1xf32>
    %40 = arith.divf %38, %39 : vector<16x1xf32>
    %41 = arith.mulf %36, %36 : vector<16x256xf32>
    %cst_20 = arith.constant dense<0.000000e+00> : vector<16xf32>
    %42 = vector.multi_reduction <add>, %41, %cst_20 [1] : vector<16x256xf32> to vector<16xf32>
    %43 = vector.shape_cast %42 : vector<16xf32> to vector<16x1xf32>
    %cst_21 = arith.constant 2.560000e+02 : f32
    %44 = vector.broadcast %cst_21 : f32 to vector<16x1xf32>
    %45 = arith.divf %43, %44 : vector<16x1xf32>
    %46 = arith.mulf %40, %40 : vector<16x1xf32>
    %47 = arith.subf %45, %46 : vector<16x1xf32>
    %cst_22 = arith.constant 0.000000e+00 : f32
    %48 = vector.broadcast %cst_22 : f32 to vector<16x1xf32>
    %49 = arith.maximumf %47, %48 : vector<16x1xf32>
    %50 = vector.broadcast %40 : vector<16x1xf32> to vector<16x256xf32>
    %51 = arith.subf %36, %50 : vector<16x256xf32>
    %cst_23 = arith.constant 9.99999974E-6 : f32
    %52 = vector.broadcast %cst_23 : f32 to vector<16x1xf32>
    %53 = arith.addf %49, %52 : vector<16x1xf32>
    %54 = math.rsqrt %53 : vector<16x1xf32>
    %55 = vector.broadcast %54 : vector<16x1xf32> to vector<16x256xf32>
    %56 = arith.mulf %51, %55 : vector<16x256xf32>
    %57 = arith.addf %56, %28 : vector<16x256xf32>
    %58 = arith.truncf %57 : vector<16x256xf32> to vector<16x256xbf16>
    %c0_24 = arith.constant 0 : index
    %c0_25 = arith.constant 0 : index
    %59 = vector.load %arg6[%c0_24, %c0_25] : memref<256x256xbf16, #tpu.memory_space<vmem>>, vector<256x256xbf16>
    %cst_26 = arith.constant dense<0.000000e+00> : vector<16x256xf32>
    %60 = tpu.matmul %58, %59, %cst_26 {dimension_numbers = #tpu.dot_dimension_numbers<[1], [0], [0], [1], [0, 0, 1, 1], [], []>} : vector<16x256xbf16>, vector<256x256xbf16>, vector<16x256xf32> -> vector<16x256xf32>
    %c0_27 = arith.constant 0 : index
    %c0_28 = arith.constant 0 : index
    %61 = vector.load %arg7[%c0_27, %c0_28] : memref<1x256xf32, #tpu.memory_space<vmem>>, vector<1x256xf32>
    %62 = vector.broadcast %61 : vector<1x256xf32> to vector<16x256xf32>
    %63 = arith.addf %60, %62 : vector<16x256xf32>
    %cst_29 = arith.constant 0.000000e+00 : f32
    %64 = vector.broadcast %cst_29 : f32 to vector<16x256xf32>
    %65 = arith.maximumf %63, %64 : vector<16x256xf32>
    %cst_30 = arith.constant dense<0.000000e+00> : vector<16xf32>
    %66 = vector.multi_reduction <add>, %65, %cst_30 [1] : vector<16x256xf32> to vector<16xf32>
    %67 = vector.shape_cast %66 : vector<16xf32> to vector<16x1xf32>
    %cst_31 = arith.constant 2.560000e+02 : f32
    %68 = vector.broadcast %cst_31 : f32 to vector<16x1xf32>
    %69 = arith.divf %67, %68 : vector<16x1xf32>
    %70 = arith.mulf %65, %65 : vector<16x256xf32>
    %cst_32 = arith.constant dense<0.000000e+00> : vector<16xf32>
    %71 = vector.multi_reduction <add>, %70, %cst_32 [1] : vector<16x256xf32> to vector<16xf32>
    %72 = vector.shape_cast %71 : vector<16xf32> to vector<16x1xf32>
    %cst_33 = arith.constant 2.560000e+02 : f32
    %73 = vector.broadcast %cst_33 : f32 to vector<16x1xf32>
    %74 = arith.divf %72, %73 : vector<16x1xf32>
    %75 = arith.mulf %69, %69 : vector<16x1xf32>
    %76 = arith.subf %74, %75 : vector<16x1xf32>
    %cst_34 = arith.constant 0.000000e+00 : f32
    %77 = vector.broadcast %cst_34 : f32 to vector<16x1xf32>
    %78 = arith.maximumf %76, %77 : vector<16x1xf32>
    %79 = vector.broadcast %69 : vector<16x1xf32> to vector<16x256xf32>
    %80 = arith.subf %65, %79 : vector<16x256xf32>
    %cst_35 = arith.constant 9.99999974E-6 : f32
    %81 = vector.broadcast %cst_35 : f32 to vector<16x1xf32>
    %82 = arith.addf %78, %81 : vector<16x1xf32>
    %83 = math.rsqrt %82 : vector<16x1xf32>
    %84 = vector.broadcast %83 : vector<16x1xf32> to vector<16x256xf32>
    %85 = arith.mulf %80, %84 : vector<16x256xf32>
    %86 = arith.addf %85, %57 : vector<16x256xf32>
    %87 = arith.truncf %86 : vector<16x256xf32> to vector<16x256xbf16>
    %c0_36 = arith.constant 0 : index
    %c0_37 = arith.constant 0 : index
    %88 = vector.load %arg8[%c0_36, %c0_37] : memref<256x128xbf16, #tpu.memory_space<vmem>>, vector<256x128xbf16>
    %cst_38 = arith.constant dense<0.000000e+00> : vector<16x128xf32>
    %89 = tpu.matmul %87, %88, %cst_38 {dimension_numbers = #tpu.dot_dimension_numbers<[1], [0], [0], [1], [0, 0, 1, 1], [], []>} : vector<16x256xbf16>, vector<256x128xbf16>, vector<16x128xf32> -> vector<16x128xf32>
    %c0_39 = arith.constant 0 : index
    %c0_40 = arith.constant 0 : index
    %90 = vector.load %arg9[%c0_39, %c0_40] : memref<1x128xf32, #tpu.memory_space<vmem>>, vector<1x128xf32>
    %91 = vector.broadcast %90 : vector<1x128xf32> to vector<16x128xf32>
    %92 = arith.addf %89, %91 : vector<16x128xf32>
    %cst_41 = arith.constant dense<0xFF800000> : vector<16xf32>
    %93 = vector.multi_reduction <maximumf>, %92, %cst_41 [1] : vector<16x128xf32> to vector<16xf32>
    %94 = vector.shape_cast %93 : vector<16xf32> to vector<16x1xf32>
    %95 = vector.broadcast %94 : vector<16x1xf32> to vector<16x128xf32>
    %96 = arith.subf %92, %95 : vector<16x128xf32>
    %97 = math.exp %96 : vector<16x128xf32>
    %cst_42 = arith.constant dense<0.000000e+00> : vector<16xf32>
    %98 = vector.multi_reduction <add>, %97, %cst_42 [1] : vector<16x128xf32> to vector<16xf32>
    %99 = vector.shape_cast %98 : vector<16xf32> to vector<16x1xf32>
    %100 = tpu.reciprocal %99 {approx = true} : vector<16x1xf32> -> vector<16x1xf32>
    %101 = vector.broadcast %100 : vector<16x1xf32> to vector<16x128xf32>
    %102 = arith.mulf %97, %101 : vector<16x128xf32>
    %103 = arith.truncf %102 : vector<16x128xf32> to vector<16x128xbf16>
    %c0_43 = arith.constant 0 : index
    %c0_44 = arith.constant 0 : index
    %104 = vector.load %arg10[%c0_43, %c0_44] : memref<16x128xbf16, #tpu.memory_space<vmem>>, vector<16x128xbf16>
    tpu.vector_store %arg10[%c0_43, %c0_44], %103 {strides = array<i32>} : memref<16x128xbf16, #tpu.memory_space<vmem>>, vector<16x128xbf16>,
    return
  }
  func.func @transform_0(%arg0: i32) -> (i32, i32) {
    %c0_i32 = arith.constant 0 : i32
    %c0_i32_0 = arith.constant 0 : i32
    return %arg0, %c0_i32 : i32, i32
  }
  func.func @transform_1(%arg0: i32) -> (i32, i32) {
    %c0_i32 = arith.constant 0 : i32
    %c0_i32_0 = arith.constant 0 : i32
    %c0_i32_1 = arith.constant 0 : i32
    return %c0_i32, %c0_i32_0 : i32, i32
  }
  func.func @transform_2(%arg0: i32) -> (i32, i32) {
    %c0_i32 = arith.constant 0 : i32
    %c0_i32_0 = arith.constant 0 : i32
    %c0_i32_1 = arith.constant 0 : i32
    return %c0_i32, %c0_i32_0 : i32, i32
  }
  func.func @transform_3(%arg0: i32) -> (i32, i32) {
    %c0_i32 = arith.constant 0 : i32
    %c0_i32_0 = arith.constant 0 : i32
    %c0_i32_1 = arith.constant 0 : i32
    return %c0_i32, %c0_i32_0 : i32, i32
  }
  func.func @transform_4(%arg0: i32) -> (i32, i32) {
    %c0_i32 = arith.constant 0 : i32
    %c0_i32_0 = arith.constant 0 : i32
    %c0_i32_1 = arith.constant 0 : i32
    return %c0_i32, %c0_i32_0 : i32, i32
  }
  func.func @transform_5(%arg0: i32) -> (i32, i32) {
    %c0_i32 = arith.constant 0 : i32
    %c0_i32_0 = arith.constant 0 : i32
    %c0_i32_1 = arith.constant 0 : i32
    return %c0_i32, %c0_i32_0 : i32, i32
  }
  func.func @transform_6(%arg0: i32) -> (i32, i32) {
    %c0_i32 = arith.constant 0 : i32
    %c0_i32_0 = arith.constant 0 : i32
    %c0_i32_1 = arith.constant 0 : i32
    return %c0_i32, %c0_i32_0 : i32, i32
  }
  func.func @transform_7(%arg0: i32) -> (i32, i32) {
    %c0_i32 = arith.constant 0 : i32
    %c0_i32_0 = arith.constant 0 : i32
    %c0_i32_1 = arith.constant 0 : i32
    return %c0_i32, %c0_i32_0 : i32, i32
  }
  func.func @transform_8(%arg0: i32) -> (i32, i32) {
    %c0_i32 = arith.constant 0 : i32
    %c0_i32_0 = arith.constant 0 : i32
    %c0_i32_1 = arith.constant 0 : i32
    return %c0_i32, %c0_i32_0 : i32, i32
  }
  func.func @transform_9(%arg0: i32) -> (i32, i32) {
    %c0_i32 = arith.constant 0 : i32
    %c0_i32_0 = arith.constant 0 : i32
    return %arg0, %c0_i32 : i32, i32
  }
}

</mosaic_0001>

<bundles_post_ra>
// kernel: meta_strategy_forward.1
= control target key start
LH: loop header
LB: loop body
LE: loop exit
PB: predicated region body
PF: predicated region fallthrough
CT: control target
= control target key end

     0   :  { %14 = vsyncpa [#allocation3], 0  ;;  %s2047_s0 = inlined_call_operand.hbm [shape: f32[2,17], index: 0, kind: input, shape index: {}]   ;;  %s2048_s1 = inlined_call_operand.hbm [shape: bf16[17,256], index: 1, kind: input, shape index: {}]   ;;  %s2049_s2 = inlined_call_operand.hbm [shape: f32[1,256], index: 2, kind: input, shape index: {}]   ;;  %s2050_s3 = inlined_call_operand.hbm [shape: bf16[256,256], index: 3, kind: input, shape index: {}]   ;;  %s2051_s4 = inlined_call_operand.hbm [shape: f32[1,256], index: 4, kind: input, shape index: {}]   ;;  %s2052_s5 = inlined_call_operand.hbm [shape: bf16[256,256], index: 5, kind: input, shape index: {}]   ;;  %s2053_s6 = inlined_call_operand.vmem [shape: f32[1,256], index: 6, kind: input, shape index: {}]   ;;  %s2054_s7 = inlined_call_operand.hbm [shape: bf16[256,128], index: 7, kind: input, shape index: {}]   ;;  %s2055_s8 = inlined_call_operand.vmem [shape: f32[1,128], index: 8, kind: input, shape index: {}]   ;;  %s2056_s9 = inlined_call_operand.vmem [shape: bf16[2,128], index: 9, kind: output, shape index: {}]  }
   0x1   :  { %15 = vsyncpa [#allocation5], 0 }
   0x2   :  { %16 = vsyncpa [#allocation8], 0 }
   0x3   :  { %17 = vsyncpa [#allocation11], 0  ;;  %s35_s11 = sshll.u32 %s2048_s1, 4  ;;  %s36_s11 = int_to_ptr.hbm [resolvable:$true] %s35_s11 }
   0x4   :  { %21 = vsyncadd [#allocation3], 224  ;;  %s1813_s12 = smov [#allocation4]   ;;  %s59_s16 = sshll.u32 %s2050_s3, 4  ;;  %s60_s16 = int_to_ptr.hbm [resolvable:$true] %s59_s16 }
   0x5   :  { %s37_s13 = sshll.u32 %s1813_s12, 4  ;;  %s1814_s17 = smov 128   ;;  %s38_s13 = int_to_ptr.vmem [resolvable:$true] %s37_s13 }
   0x6   :  { %s1815_s18 = smov 8   ;;  %s1816_s19 = smov [#allocation7]  }
   0x7   :  { %43 = dma.hbm_to_vmem [thread:$0]  %s36_s11, 384, %s38_s13, [#allocation5], %s1814_s17, %s1814_s17, %s1815_s18  }
   0x8   :  { %s61_s20 = sshll.u32 %s1816_s19, 4  ;;  %s83_s23 = sshll.u32 %s2052_s5, 4  ;;  %s62_s20 = int_to_ptr.vmem [resolvable:$true] %s61_s20  ;;  %s84_s23 = int_to_ptr.hbm [resolvable:$true] %s83_s23 }
   0x9   :  { %67 = dma.hbm_to_vmem [thread:$0]  %s60_s16, 4096, %s62_s20, [#allocation8], %s1814_s17, %s1814_s17, %s1815_s18  }
   0xa   :  { %s22_s25 = sshll.u32 %s2047_s0, 4  ;;  %s1817_s26 = smov [#allocation10]   ;;  %s23_s25 = int_to_ptr.hbm [resolvable:$true] %s22_s25 }
   0xb   :  { %s85_s27 = sshll.u32 %s1817_s26, 4  ;;  %s1818_s3 = smov [#allocation2]   ;;  %s86_s27 = int_to_ptr.vmem [resolvable:$true] %s85_s27 }
   0xc   :  { %91 = dma.hbm_to_vmem [thread:$0]  %s84_s23, 4096, %s86_s27, [#allocation11], %s1814_s17, %s1814_s17, %s1815_s18  }
   0xd   :  { %s24_s28 = sshll.u32 %s1818_s3, 4  ;;  %s1819_s29 = smov 32   ;;  %s25_s28 = int_to_ptr.vmem [resolvable:$true] %s24_s28 }
   0xe   :  { %s1820_s30 = smov 2   ;;  %s49_s11 = sshll.u32 %s2049_s2, 4  ;;  %s50_s11 = int_to_ptr.hbm [resolvable:$true] %s49_s11 }
   0xf   :  { %30 = dma.hbm_to_vmem [thread:$0]  %s23_s25, 32, %s25_s28, [#allocation3], %s1819_s29, %s1819_s29, %s1820_s30  }
  0x10   :  { %s1821_s12 = smov [#allocation6]   ;;  %s73_s15 = sshll.u32 %s2051_s4, 4  ;;  %s74_s15 = int_to_ptr.hbm [resolvable:$true] %s73_s15 }
  0x11   :  { %s51_s13 = sshll.u32 %s1821_s12, 4  ;;  %s1822_s16 = smov [#allocation9]   ;;  %s52_s13 = int_to_ptr.vmem [resolvable:$true] %s51_s13 }
  0x12   :  { %54 = dma.hbm_to_vmem [thread:$0]  %s50_s11, 32, %s52_s13, [#allocation5]  }
  0x13   :  { %s75_s17 = sshll.u32 %s1822_s16, 4  ;;  %s98_s20 = sshll.u32 %s2054_s7, 4  ;;  %s76_s17 = int_to_ptr.vmem [resolvable:$true] %s75_s17  ;;  %s99_s20 = int_to_ptr.hbm [resolvable:$true] %s98_s20 }
  0x14   :  { %78 = dma.hbm_to_vmem [thread:$0]  %s74_s15, 32, %s76_s17, [#allocation8]  }
  0x15   :  { %s1823_s2 = smov [#allocation12]   ;;  %s1824_s22 = smov 64  }
  0x16   :  { %s100_s21 = sshll.u32 %s1823_s2, 4  ;;  %s1825_s23 = smov 4   ;;  %s101_s21 = int_to_ptr.vmem [resolvable:$true] %s100_s21 }
  0x17   :  { %106 = dma.hbm_to_vmem [thread:$0]  %s99_s20, 2048, %s101_s21, [#allocation11], %s1824_s22, %s1824_s22, %s1825_s23  }
  0x18   :  { %1805 = dma.done.wait [#allocation3], 256  }
  0x19   :  { %1806 = vsyncadd [#allocation3], 4294967040 }
  0x1a   :  { %1807 = dma.done.wait [#allocation5], 416  }
  0x1b   :  { %1808 = vsyncadd [#allocation5], 4294966880 }
  0x1c   :  { %1809 = dma.done.wait [#allocation8], 4128  }
  0x1d   :  { %1810 = vsyncadd [#allocation8], 4294963168 }
  0x1e   :  { %1811 = dma.done.wait [#allocation11], 6144  }
  0x1f   :  { %1812 = vsyncadd [#allocation11], 4294961152  ;;  %vm169_vm0 = vcmask 1040384   ;;  %v143_v0 = vld [vmem:[#allocation4 + $0x10] sm:$0x11]  ;;  %v1826_v3 = vmov 0  }
  0x20   :  { %v157_v1 = vunpack.c.l.b16 %v143_v0  ;;  %v158_v2 = vunpack.c.h.b16 %v143_v0  ;;  %v171_v4 = vsel %vm169_vm0, 65535, %v1826_v3  ;;  %v1189_v7 = vld [vmem:[#allocation4] sm:$0xf]  ;;  %v1518_v8 = vld [vmem:[#allocation4 + $0x4] sm:$0xf0]  ;;  %v138_v15 = vld [vmem:[#allocation2] sm:$0xff] }
  0x21   :  { %v1517_v9 = vld [vmem:[#allocation4 + $0x4] sm:$0xf]  ;;  %v1191_v10 = vld [vmem:[#allocation4 + $0x8] sm:$0xf0]  ;;  %v1190_v13 = vor.u32 %v1518_v8, %v1189_v7  ;;  %v139_v16 = vld [vmem:[#allocation2 + $0x8] sm:$0xff]  ;;  %vm165_vm1 = vcmask 138240  }
  0x22   :  { %v161_v5 = vpack.c.b16 %v157_v1, %v157_v1  ;;  %v162_v6 = vpack.c.b16 %v158_v2, %v158_v2  ;;  %v1194_v14 = vor.u32 %v1517_v9, %v1191_v10  ;;  %v140_v17 = vpack.c.bf16 %v139_v16, %v138_v15  ;;  %v144_v18 = vld [vmem:[#allocation6] sm:$0x3]  ;;  %v1255_v42 = vld [vmem:[#allocation7 + $0x70] sm:$0xf]  ;;  %v1534_v43 = vld [vmem:[#allocation7 + $0x74] sm:$0xf0] }
  0x23   :  { %v146_v19 = vperm.slane %v144_v18, 0  ;;  %v147_v20 = vperm.slane %v144_v18, 1  ;;  %v1827_v41 = vmov 256.0   ;;  %v1319_v44 = vld [vmem:[#allocation7 + $0xf0] sm:$0xf]  ;;  %v1256_v45 = vor.u32 %v1534_v43, %v1255_v42 }
  0x24   :  { %v173_v11 = vand.u32 %v171_v4, %v161_v5  ;;  %v176_v12 = vand.u32 %v171_v4, %v162_v6  ;;  %1615 = vrcp.f32 %v1827_v41  ;;  %v1550_v46 = vld [vmem:[#allocation7 + $0xf4] sm:$0xf0]  ;;  %v1533_v47 = vld [vmem:[#allocation7 + $0x74] sm:$0xf]  ;;  %v1257_v48 = vld [vmem:[#allocation7 + $0x78] sm:$0xf0] }
  0x25   :  { %v1320_v49 = vor.u32 %v1550_v46, %v1319_v44  ;;  %v1260_v50 = vor.u32 %v1533_v47, %v1257_v48  ;;  %v1549_v51 = vld [vmem:[#allocation7 + $0xf4] sm:$0xf]  ;;  %v1321_v52 = vld [vmem:[#allocation7 + $0xf8] sm:$0xf0]  ;;  %473 = vmatpush.bf16.msra.mxu2 %v1256_v45  ;;  %v1247_v55 = vld [vmem:[#allocation7 + $0x60] sm:$0xf] }
  0x26   :  { %184 = vmatpush.bf16.msra.mxu0 %v173_v11  ;;  %198 = vmatpush.bf16.msra.mxu1 %v176_v12  ;;  %v1324_v53 = vor.u32 %v1549_v51, %v1321_v52  ;;  %v1532_v56 = vld [vmem:[#allocation7 + $0x64] sm:$0xf0]  ;;  %v1311_v57 = vld [vmem:[#allocation7 + $0xe0] sm:$0xf]  ;;  %v1531_v60 = vld [vmem:[#allocation7 + $0x64] sm:$0xf] }
  0x27   :  { %487 = vmatpush.bf16.msra.mxu3 %v1320_v49  ;;  %v1248_v58 = vor.u32 %v1532_v56, %v1247_v55  ;;  %v1548_v59 = vld [vmem:[#allocation7 + $0xe4] sm:$0xf0]  ;;  %v1249_v61 = vld [vmem:[#allocation7 + $0x68] sm:$0xf0]  ;;  %v1547_v1 = vld [vmem:[#allocation7 + $0xe4] sm:$0xf] }
  0x28   :  { %v1312_v63 = vor.u32 %v1548_v59, %v1311_v57  ;;  %v1252_v0 = vor.u32 %v1531_v60, %v1249_v61  ;;  %v1313_v2 = vld [vmem:[#allocation7 + $0xe8] sm:$0xf0]  ;;  %v1239_v4 = vld [vmem:[#allocation7 + $0x50] sm:$0xf]  ;;  %v1530_v5 = vld [vmem:[#allocation7 + $0x54] sm:$0xf0] }
  0x29   :  { %474 = vmatpush.bf16.msra.mxu2 %v1248_v58  ;;  %v1316_v3 = vor.u32 %v1547_v1, %v1313_v2  ;;  %v1303_v6 = vld [vmem:[#allocation7 + $0xd0] sm:$0xf]  ;;  %v1240_v7 = vor.u32 %v1530_v5, %v1239_v4  ;;  %v1546_v8 = vld [vmem:[#allocation7 + $0xd4] sm:$0xf0]  ;;  %v1529_v9 = vld [vmem:[#allocation7 + $0x54] sm:$0xf] }
  0x2a   :  { %185 = vmatpush.bf16.msra.mxu0 %v1190_v13  ;;  %199 = vmatpush.bf16.msra.mxu1 %v1194_v14  ;;  %v1920_v54 = vpop.eup %1615  ;;  %v1241_v10 = vld [vmem:[#allocation7 + $0x58] sm:$0xf0]  ;;  %v1304_v12 = vor.u32 %v1546_v8, %v1303_v6  ;;  %v1545_v14 = vld [vmem:[#allocation7 + $0xd4] sm:$0xf]  ;;  %v1528_v18 = vld [vmem:[#allocation7 + $0x44] sm:$0xf0] }
  0x2b   :  { %v217_v62 = vmul.f32 256.0, %v1920_v54  ;;  %488 = vmatpush.bf16.msra.mxu3 %v1312_v63  ;;  %v1244_v13 = vor.u32 %v1529_v9, %v1241_v10  ;;  %v1305_v15 = vld [vmem:[#allocation7 + $0xd8] sm:$0xf0]  ;;  %v1541_v44 = vld [vmem:[#allocation7 + $0xb4] sm:$0xf]  ;;  %vm221_vm2 = vweird.f32 %v1920_v54 }
  0x2c   :  { %v1308_v16 = vor.u32 %v1545_v14, %v1305_v15  ;;  %v1289_v45 = vld [vmem:[#allocation7 + $0xb8] sm:$0xf0]  ;;  %v1215_v47 = vld [vmem:[#allocation7 + $0x20] sm:$0xf]  ;;  %v1524_v48 = vld [vmem:[#allocation7 + $0x24] sm:$0xf0] }
  0x2d   :  { %1195 = vmatmul.msk.bf16.vlgmr.msra.gmra.mxu0 %vm165_vm1, %v140_v17  ;;  %1196 = vmatmul.msk.bf16.vlgmr.msra.gmra.mxu1 %vm165_vm1, %v140_v17  ;;  %v218_v11 = vsub.f32 1.0, %v217_v62  ;;  %v1231_v17 = vld [vmem:[#allocation7 + $0x40] sm:$0xf]  ;;  %v1292_v46 = vor.u32 %v1541_v44, %v1289_v45  ;;  %v1540_v51 = vld [vmem:[#allocation7 + $0xa4] sm:$0xf0] }
  0x2e   :  { %501 = vmatpush.bf16.msrb.mxu0 %v1260_v50  ;;  %515 = vmatpush.bf16.msrb.mxu1 %v1324_v53  ;;  %v1279_v49 = vld [vmem:[#allocation7 + $0xa0] sm:$0xf]  ;;  %v1216_v50 = vor.u32 %v1524_v48, %v1215_v47  ;;  %v1523_v52 = vld [vmem:[#allocation7 + $0x24] sm:$0xf]  ;;  %v1217_v53 = vld [vmem:[#allocation7 + $0x28] sm:$0xf0] }
  0x2f   :  { %475 = vmatpush.bf16.msra.mxu2 %v1240_v7  ;;  %489 = vmatpush.bf16.msra.mxu3 %v1304_v12  ;;  %v1280_v56 = vor.u32 %v1540_v51, %v1279_v49  ;;  %v1220_v57 = vor.u32 %v1523_v52, %v1217_v53  ;;  %v1539_v58 = vld [vmem:[#allocation7 + $0xa4] sm:$0xf]  ;;  %v1281_v59 = vld [vmem:[#allocation7 + $0xa8] sm:$0xf0]  ;;  %v1207_v61 = vld [vmem:[#allocation7 + $0x10] sm:$0xf] }
  0x30   :  { %v1284_v60 = vor.u32 %v1539_v58, %v1281_v59  ;;  %v1522_v62 = vld [vmem:[#allocation7 + $0x14] sm:$0xf0]  ;;  %v1271_v63 = vld [vmem:[#allocation7 + $0x90] sm:$0xf]  ;;  %v1209_v4 = vld [vmem:[#allocation7 + $0x18] sm:$0xf0] }
  0x31   :  { %v1208_v1 = vor.u32 %v1522_v62, %v1207_v61  ;;  %v1538_v2 = vld [vmem:[#allocation7 + $0x94] sm:$0xf0]  ;;  %v1537_v7 = vld [vmem:[#allocation7 + $0x94] sm:$0xf]  ;;  %v1273_v8 = vld [vmem:[#allocation7 + $0x98] sm:$0xf0] }
  0x32   :  { %502 = vmatpush.bf16.msrb.mxu0 %v1252_v0  ;;  %516 = vmatpush.bf16.msrb.mxu1 %v1316_v3  ;;  %v1521_v3 = vld [vmem:[#allocation7 + $0x14] sm:$0xf]  ;;  %v1199_v9 = vld [vmem:[#allocation7] sm:$0xf]  ;;  %v1520_v12 = vld [vmem:[#allocation7 + $0x4] sm:$0xf0] }
  0x33   :  { %v1212_v6 = vor.u32 %v1521_v3, %v1209_v4  ;;  %v1536_v14 = vld [vmem:[#allocation7 + $0x84] sm:$0xf0] }
  0x36   :  { %503 = vmatpush.bf16.msrb.mxu0 %v1244_v13  ;;  %517 = vmatpush.bf16.msrb.mxu1 %v1308_v16  ;;  %v1263_v13 = vld [vmem:[#allocation7 + $0x80] sm:$0xf] }
  0xaa   :  { %v187_v21 = vpop.f32.mrf.mxu0  ;;  %v201_v22 = vpop.f32.mrf.mxu1 }
  0xab   :  { %v188_v23 = vadd.f32 %v187_v21, %v146_v19  ;;  %v202_v24 = vadd.f32 %v201_v22, %v147_v20  ;;  %v1544_v21 = vld [vmem:[#allocation7 + $0xc4] sm:$0xf0]  ;;  %v1527_v22 = vld [vmem:[#allocation7 + $0x44] sm:$0xf] }
  0xad   :  { %v1900_v25 = vmax.f32 %v188_v23, 0.0  ;;  %v1902_v26 = vmax.f32 %v202_v24, 0.0  ;;  %v1233_v23 = vld [vmem:[#allocation7 + $0x48] sm:$0xf0]  ;;  %v219_v24 = vmul.f32 %v1920_v54, %v218_v11  ;;  %v1276_v11 = vor.u32 %v1537_v7, %v1273_v8 }
  0xaf   :  { %v210_v27 = vadd.f32 %v1902_v26, %v1900_v25  ;;  %v225_v28 = vmul.f32 %v1900_v25, %v1900_v25  ;;  %v226_v29 = vmul.f32 %v1902_v26, %v1902_v26  ;;  %v220_v41 = vadd.f32 %v1920_v54, %v219_v24 }
  0xb1   :  { %211 = vadd.xlane.f32.xlu0 %v210_v27  ;;  %v229_v30 = vadd.f32 %v226_v29, %v225_v28  ;;  %v1236_v28 = vor.u32 %v1527_v22, %v1233_v23  ;;  %v1543_v29 = vld [vmem:[#allocation7 + $0xc4] sm:$0xf]  ;;  %v1927_v55 = vsel %vm221_vm2, %v1920_v54, %v220_v41  ;;  %v1272_v54 = vor.u32 %v1538_v2, %v1271_v63  ;;  %v1265_v23 = vld [vmem:[#allocation7 + $0x88] sm:$0xf0] }
  0xb2   :  { %v189_v31 = vpop.f32.mrf.mxu0  ;;  %v203_v32 = vpop.f32.mrf.mxu1 }
  0xb3   :  { %v190_v33 = vadd.f32 %v189_v31, %v146_v19  ;;  %v204_v34 = vadd.f32 %v203_v32, %v147_v20  ;;  %230 = vadd.xlane.f32.xlu1 %v229_v30  ;;  %v1295_v19 = vld [vmem:[#allocation7 + $0xc0] sm:$0xf]  ;;  %v1232_v20 = vor.u32 %v1528_v18, %v1231_v17  ;;  %v1297_v30 = vld [vmem:[#allocation7 + $0xc8] sm:$0xf0]  ;;  %504 = vmatpush.bf16.msrb.mxu0 %v1236_v28  ;;  %v1223_v32 = vld [vmem:[#allocation7 + $0x30] sm:$0xf] }
  0xb4   :  { %v1296_v27 = vor.u32 %v1544_v21, %v1295_v19  ;;  %v1300_v31 = vor.u32 %v1543_v29, %v1297_v30  ;;  %v1519_v17 = vld [vmem:[#allocation7 + $0x4] sm:$0xf]  ;;  %v1201_v18 = vld [vmem:[#allocation7 + $0x8] sm:$0xf0]  ;;  %v1264_v21 = vor.u32 %v1536_v14, %v1263_v13 }
  0xb5   :  { %v1910_v35 = vmax.f32 %v190_v33, 0.0  ;;  %v1912_v36 = vmax.f32 %v204_v34, 0.0  ;;  %476 = vmatpush.bf16.msra.mxu2 %v1232_v20  ;;  %v1526_v33 = vld [vmem:[#allocation7 + $0x34] sm:$0xf0]  ;;  %v1287_v34 = vld [vmem:[#allocation7 + $0xb0] sm:$0xf]  ;;  %v1200_v20 = vor.u32 %v1520_v12, %v1199_v9  ;;  %v1204_v22 = vor.u32 %v1519_v17, %v1201_v18 }
  0xb6   :  { %490 = vmatpush.bf16.msra.mxu3 %v1296_v27  ;;  %518 = vmatpush.bf16.msrb.mxu1 %v1300_v31  ;;  %v1535_v19 = vld [vmem:[#allocation7 + $0x84] sm:$0xf] }
  0xb7   :  { %v213_v37 = vadd.f32 %v1912_v36, %v1910_v35  ;;  %v227_v38 = vmul.f32 %v1910_v35, %v1910_v35  ;;  %v228_v39 = vmul.f32 %v1912_v36, %v1912_v36  ;;  %v1268_v27 = vor.u32 %v1535_v19, %v1265_v23 }
  0xb9   :  { %214 = vadd.xlane.f32.xlu0 %v213_v37  ;;  %v232_v40 = vadd.f32 %v228_v39, %v227_v38  ;;  %v1224_v37 = vor.u32 %v1526_v33, %v1223_v32  ;;  %v1542_v38 = vld [vmem:[#allocation7 + $0xb4] sm:$0xf0]  ;;  %v1525_v39 = vld [vmem:[#allocation7 + $0x34] sm:$0xf] }
  0xba   :  { %v1288_v42 = vor.u32 %v1542_v38, %v1287_v34  ;;  %519 = vmatpush.bf16.msrb.mxu1 %v1292_v46 }
  0xbb   :  { %233 = vadd.xlane.f32.xlu1 %v232_v40  ;;  %v1225_v40 = vld [vmem:[#allocation7 + $0x38] sm:$0xf0]  ;;  %477 = vmatpush.bf16.msra.mxu2 %v1224_v37 }
  0xbc   :  { %v1228_v43 = vor.u32 %v1525_v39, %v1225_v40  ;;  %491 = vmatpush.bf16.msra.mxu3 %v1288_v42 }
  0xbe   :  { %505 = vmatpush.bf16.msrb.mxu0 %v1228_v43  ;;  %520 = vmatpush.bf16.msrb.mxu1 %v1284_v60 }
  0xbf   :  { %478 = vmatpush.bf16.msra.mxu2 %v1216_v50 }
  0xc0   :  { %492 = vmatpush.bf16.msra.mxu3 %v1280_v56 }
  0xc2   :  { %506 = vmatpush.bf16.msrb.mxu0 %v1220_v57  ;;  %521 = vmatpush.bf16.msrb.mxu1 %v1276_v11 }
  0xc3   :  { %479 = vmatpush.bf16.msra.mxu2 %v1208_v1 }
  0xc4   :  { %493 = vmatpush.bf16.msra.mxu3 %v1272_v54 }
  0xc6   :  { %507 = vmatpush.bf16.msrb.mxu0 %v1212_v6  ;;  %522 = vmatpush.bf16.msrb.mxu1 %v1268_v27 }
  0xc7   :  { %480 = vmatpush.bf16.msra.mxu2 %v1200_v20 }
  0xc8   :  { %494 = vmatpush.bf16.msra.mxu3 %v1264_v21 }
  0xca   :  { %508 = vmatpush.bf16.msrb.mxu0 %v1204_v22 }
 0x124   :  { %v212_v0 = vpop.xlane.xlu0 %211 }
 0x125   :  { %v1930_v5 = vmul.f32 %v1927_v55, %v212_v0 }
 0x126   :  { %v231_v10 = vpop.xlane.xlu1 %230 }
 0x127   :  { %v235_v15 = vmul.f32 %v231_v10, %v1927_v55  ;;  %v237_v16 = vmul.f32 %v1930_v5, %v1930_v5  ;;  %v243_v53 = vsub.f32 %v1900_v25, %v1930_v5  ;;  %v244_v56 = vsub.f32 %v1902_v26, %v1930_v5 }
 0x129   :  { %v239_v24 = vsub.f32 %v235_v15, %v237_v16 }
 0x12b   :  { %v241_v28 = vmax.f32 %v239_v24, 0.0 }
 0x12c   :  { %v215_v29 = vpop.xlane.xlu0 %214 }
 0x12d   :  { %v247_v30 = vadd.f32 1e-05, %v241_v28  ;;  %v224_v31 = vmul.f32 %v1927_v55, %v215_v29 }
 0x12e   :  { %v234_v32 = vpop.xlane.xlu1 %233 }
 0x12f   :  { %1617 = vrsqrt.f32 %v247_v30  ;;  %v236_v33 = vmul.f32 %v234_v32, %v1927_v55  ;;  %v238_v34 = vmul.f32 %v224_v31, %v224_v31  ;;  %vm255_vm4 = vweird.f32 %v247_v30  ;;  %v1447_v32 = vld [vmem:[#allocation10 + $0xf0] sm:$0xf] }
 0x130   :  { %v245_v57 = vsub.f32 %v1910_v35, %v224_v31  ;;  %v246_v58 = vsub.f32 %v1912_v36, %v224_v31  ;;  %v307_v35 = vld [vmem:[#allocation9] sm:$0x3]  ;;  %v1566_v31 = vld [vmem:[#allocation10 + $0x74] sm:$0xf0] }
 0x131   :  { %v240_v37 = vsub.f32 %v236_v33, %v238_v34  ;;  %v310_v36 = vperm.slane %v307_v35, 1  ;;  %v309_v3 = vperm.slane %v307_v35, 0  ;;  %v1582_v34 = vld [vmem:[#allocation10 + $0xf4] sm:$0xf0] }
 0x132   :  { %v1578_v35 = vld [vmem:[#allocation10 + $0xd4] sm:$0xf0] }
 0x133   :  { %v242_v38 = vmax.f32 %v240_v37, 0.0  ;;  %v1565_v37 = vld [vmem:[#allocation10 + $0x74] sm:$0xf] }
 0x135   :  { %v1618_v39 = vpop.eup %1617  ;;  %v248_v41 = vadd.f32 1e-05, %v242_v38  ;;  %v1385_v38 = vld [vmem:[#allocation10 + $0x78] sm:$0xf0] }
 0x136   :  { %v250_v40 = vmul.f32 %v1618_v39, %v247_v30  ;;  %vm256_vm3 = vweird.f32 %v1618_v39  ;;  %v1383_v30 = vld [vmem:[#allocation10 + $0x70] sm:$0xf] }
 0x137   :  { %1619 = vrsqrt.f32 %v248_v41  ;;  %vm257_vm6 = vmor %vm255_vm4, %vm256_vm3  ;;  %vm265_vm7 = vweird.f32 %v248_v41  ;;  %v1384_v33 = vor.u32 %v1566_v31, %v1383_v30 }
 0x138   :  { %v251_v42 = vmul.f32 %v1618_v39, %v250_v40  ;;  %v1388_v40 = vor.u32 %v1565_v37, %v1385_v38  ;;  %v1343_v37 = vld [vmem:[#allocation10 + $0x20] sm:$0xf]  ;;  %v1556_v38 = vld [vmem:[#allocation10 + $0x24] sm:$0xf0] }
 0x139   :  { %793 = vmatpush.bf16.msrb.mxu2 %v1384_v33  ;;  %v1417_v33 = vld [vmem:[#allocation10 + $0xb8] sm:$0xf0] }
 0x13a   :  { %v252_v43 = vmul.f32 0.5, %v251_v42  ;;  %v1449_v42 = vld [vmem:[#allocation10 + $0xf8] sm:$0xf0]  ;;  %821 = vmatpush.bf16.msra.mxu0 %v1388_v40  ;;  %v1344_v40 = vor.u32 %v1556_v38, %v1343_v37 }
 0x13c   :  { %v253_v46 = vsub.f32 1.5, %v252_v43 }
 0x13d   :  { %v1620_v44 = vpop.eup %1619 }
 0x13e   :  { %v260_v45 = vmul.f32 %v1620_v44, %v248_v41  ;;  %v254_v49 = vmul.f32 %v1618_v39, %v253_v46  ;;  %vm266_vm5 = vweird.f32 %v1620_v44  ;;  %v1581_v41 = vld [vmem:[#allocation10 + $0xf4] sm:$0xf]  ;;  %v1439_v46 = vld [vmem:[#allocation10 + $0xe0] sm:$0xf] }
 0x13f   :  { %vm267_vm8 = vmor %vm265_vm7, %vm266_vm5  ;;  %v1452_v43 = vor.u32 %v1581_v41, %v1449_v42  ;;  %v1572_v41 = vld [vmem:[#allocation10 + $0xa4] sm:$0xf0]  ;;  %v1555_v42 = vld [vmem:[#allocation10 + $0x24] sm:$0xf] }
 0x140   :  { %v261_v47 = vmul.f32 %v1620_v44, %v260_v45  ;;  %v258_v51 = vsel %vm257_vm6, %v1618_v39, %v254_v49  ;;  %v1448_v39 = vor.u32 %v1582_v34, %v1447_v32  ;;  %v1564_v45 = vld [vmem:[#allocation10 + $0x64] sm:$0xf0]  ;;  %v1563_v49 = vld [vmem:[#allocation10 + $0x64] sm:$0xf]  ;;  %v1573_v32 = vld [vmem:[#allocation10 + $0xb4] sm:$0xf] }
 0x141   :  { %v1943_v60 = vmul.f32 %v258_v51, %v243_v53  ;;  %v1947_v62 = vmul.f32 %v258_v51, %v244_v56  ;;  %835 = vmatpush.bf16.msra.mxu1 %v1452_v43  ;;  %v1579_v53 = vld [vmem:[#allocation10 + $0xe4] sm:$0xf]  ;;  %v1441_v56 = vld [vmem:[#allocation10 + $0xe8] sm:$0xf0]  ;;  %v1420_v34 = vor.u32 %v1573_v32, %v1417_v33 }
 0x142   :  { %v262_v48 = vmul.f32 0.5, %v261_v47  ;;  %807 = vmatpush.bf16.msrb.mxu3 %v1448_v39  ;;  %v1407_v39 = vld [vmem:[#allocation10 + $0xa0] sm:$0xf]  ;;  %v1345_v43 = vld [vmem:[#allocation10 + $0x28] sm:$0xf0] }
 0x144   :  { %v263_v50 = vsub.f32 1.5, %v262_v48  ;;  %v1580_v48 = vld [vmem:[#allocation10 + $0xe4] sm:$0xf0] }
 0x145   :  { %v1440_v51 = vor.u32 %v1580_v48, %v1439_v46  ;;  %v1348_v46 = vor.u32 %v1555_v42, %v1345_v43  ;;  %v1409_v48 = vld [vmem:[#allocation10 + $0xa8] sm:$0xf0] }
 0x146   :  { %v264_v52 = vmul.f32 %v1620_v44, %v263_v50  ;;  %v1377_v50 = vld [vmem:[#allocation10 + $0x68] sm:$0xf0] }
 0x147   :  { %808 = vmatpush.bf16.msrb.mxu3 %v1440_v51 }
 0x148   :  { %v268_v59 = vsel %vm267_vm8, %v1620_v44, %v264_v52  ;;  %v1375_v44 = vld [vmem:[#allocation10 + $0x60] sm:$0xf]  ;;  %v1380_v52 = vor.u32 %v1563_v49, %v1377_v50 }
 0x149   :  { %v1945_v61 = vmul.f32 %v268_v59, %v245_v57  ;;  %v1949_v63 = vmul.f32 %v268_v59, %v246_v58  ;;  %v1376_v47 = vor.u32 %v1564_v45, %v1375_v44  ;;  %v1444_v57 = vor.u32 %v1579_v53, %v1441_v56  ;;  %v1367_v58 = vld [vmem:[#allocation10 + $0x50] sm:$0xf]  ;;  %v1562_v59 = vld [vmem:[#allocation10 + $0x54] sm:$0xf0] }
 0x14a   :  { %822 = vmatpush.bf16.msra.mxu0 %v1380_v52  ;;  %v1408_v45 = vor.u32 %v1572_v41, %v1407_v39  ;;  %v1335_v52 = vld [vmem:[#allocation10 + $0x10] sm:$0xf]  ;;  %v1554_v53 = vld [vmem:[#allocation10 + $0x14] sm:$0xf0] }
 0x14b   :  { %v273_v25 = vpack.c.bf16 %v1945_v61, %v1943_v60  ;;  %v274_v26 = vpack.c.bf16 %v1949_v63, %v1947_v62  ;;  %794 = vmatpush.bf16.msrb.mxu2 %v1376_v47  ;;  %836 = vmatpush.bf16.msra.mxu1 %v1444_v57  ;;  %v1571_v47 = vld [vmem:[#allocation10 + $0xa4] sm:$0xf]  ;;  %v1399_v56 = vld [vmem:[#allocation10 + $0x90] sm:$0xf] }
 0x14c   :  { %v1412_v50 = vor.u32 %v1571_v47, %v1409_v48 }
 0x14d   :  { %481 = vmatmul.bf16.vlgmr.msra.gmra.mxu2 %v273_v25  ;;  %495 = vmatmul.bf16.vlgmr.msra.gmra.mxu3 %v274_v26 }
 0x14e   :  { %509 = vmatmul.bf16.vlgmr.msrb.gmra.mxu0 %v273_v25  ;;  %523 = vmatmul.bf16.vlgmr.msrb.gmra.mxu1 %v274_v26  ;;  %v1431_v25 = vld [vmem:[#allocation10 + $0xd0] sm:$0xf]  ;;  %v1368_v26 = vor.u32 %v1562_v59, %v1367_v58  ;;  %v1570_v59 = vld [vmem:[#allocation10 + $0x94] sm:$0xf0] }
 0x150   :  { %795 = vmatpush.bf16.msrb.mxu2 %v1368_v26  ;;  %v1337_v26 = vld [vmem:[#allocation10 + $0x18] sm:$0xf0] }
 0x1cb   :  { %v510_v0 = vpop.f32.mrf.mxu0  ;;  %v524_v2 = vpop.f32.mrf.mxu1 }
 0x1cc   :  { %v511_v1 = vadd.f32 %v510_v0, %v310_v36  ;;  %v1369_v0 = vld [vmem:[#allocation10 + $0x58] sm:$0xf0] }
 0x1ce   :  { %v525_v4 = vadd.f32 %v524_v2, %v511_v1  ;;  %v1432_v1 = vor.u32 %v1578_v35, %v1431_v25  ;;  %v1553_v25 = vld [vmem:[#allocation10 + $0x14] sm:$0xf]  ;;  %v1336_v35 = vor.u32 %v1554_v53, %v1335_v52 }
 0x1d0   :  { %v482_v5 = vpop.f32.mrf.mxu2  ;;  %v496_v54 = vpop.f32.mrf.mxu3  ;;  %v1955_v7 = vmax.f32 %v525_v4, 0.0  ;;  %v1433_v4 = vld [vmem:[#allocation10 + $0xd8] sm:$0xf0]  ;;  %809 = vmatpush.bf16.msrb.mxu3 %v1432_v1  ;;  %v1569_v1 = vld [vmem:[#allocation10 + $0x94] sm:$0xf] }
 0x1d1   :  { %v483_v6 = vadd.f32 %v482_v5, %v309_v3 }
 0x1d2   :  { %v542_v16 = vmul.f32 %v1955_v7, %v1955_v7 }
 0x1d3   :  { %v497_v8 = vadd.f32 %v496_v54, %v483_v6  ;;  %v512_v9 = vpop.f32.mrf.mxu0  ;;  %v526_v12 = vpop.f32.mrf.mxu1  ;;  %v1359_v54 = vld [vmem:[#allocation10 + $0x40] sm:$0xf]  ;;  %v1560_v6 = vld [vmem:[#allocation10 + $0x44] sm:$0xf0] }
 0x1d4   :  { %v513_v10 = vadd.f32 %v512_v9, %v310_v36  ;;  %v1561_v36 = vld [vmem:[#allocation10 + $0x54] sm:$0xf]  ;;  %v1360_v9 = vor.u32 %v1560_v6, %v1359_v54  ;;  %v1552_v54 = vld [vmem:[#allocation10 + $0x4] sm:$0xf0]  ;;  %v1391_v6 = vld [vmem:[#allocation10 + $0x80] sm:$0xf] }
 0x1d5   :  { %v1957_v11 = vmax.f32 %v497_v8, 0.0  ;;  %v1372_v2 = vor.u32 %v1561_v36, %v1369_v0  ;;  %v1423_v8 = vld [vmem:[#allocation10 + $0xc0] sm:$0xf]  ;;  %v1400_v36 = vor.u32 %v1570_v59, %v1399_v56  ;;  %v1340_v0 = vor.u32 %v1553_v25, %v1337_v26 }
 0x1d6   :  { %v527_v13 = vadd.f32 %v526_v12, %v513_v10  ;;  %v1576_v10 = vld [vmem:[#allocation10 + $0xc4] sm:$0xf0]  ;;  %v1559_v12 = vld [vmem:[#allocation10 + $0x44] sm:$0xf]  ;;  %796 = vmatpush.bf16.msrb.mxu2 %v1360_v9 }
 0x1d7   :  { %v533_v14 = vadd.f32 %v1955_v7, %v1957_v11  ;;  %v541_v15 = vmul.f32 %v1957_v11, %v1957_v11  ;;  %823 = vmatpush.bf16.msra.mxu0 %v1372_v2  ;;  %v1401_v2 = vld [vmem:[#allocation10 + $0x98] sm:$0xf0] }
 0x1d8   :  { %v484_v17 = vpop.f32.mrf.mxu2  ;;  %v498_v20 = vpop.f32.mrf.mxu3  ;;  %v1965_v21 = vmax.f32 %v527_v13, 0.0  ;;  %v1361_v13 = vld [vmem:[#allocation10 + $0x48] sm:$0xf0] }
 0x1d9   :  { %v485_v18 = vadd.f32 %v484_v17, %v309_v3  ;;  %534 = vadd.xlane.f32.xlu2 %v533_v14  ;;  %v545_v19 = vadd.f32 %v542_v16, %v541_v15  ;;  %v1577_v3 = vld [vmem:[#allocation10 + $0xd4] sm:$0xf]  ;;  %v1424_v14 = vor.u32 %v1576_v10, %v1423_v8  ;;  %v1364_v15 = vor.u32 %v1559_v12, %v1361_v13  ;;  %v1575_v16 = vld [vmem:[#allocation10 + $0xc4] sm:$0xf]  ;;  %v1425_v17 = vld [vmem:[#allocation10 + $0xc8] sm:$0xf0] }
 0x1da   :  { %v544_v28 = vmul.f32 %v1965_v21, %v1965_v21  ;;  %v1436_v5 = vor.u32 %v1577_v3, %v1433_v4  ;;  %v1327_v3 = vld [vmem:[#allocation10] sm:$0xf]  ;;  %v1568_v8 = vld [vmem:[#allocation10 + $0x84] sm:$0xf0]  ;;  %v1551_v12 = vld [vmem:[#allocation10 + $0x4] sm:$0xf] }
 0x1db   :  { %v499_v22 = vadd.f32 %v498_v20, %v485_v18  ;;  %546 = vadd.xlane.f32.xlu0 %v545_v19  ;;  %v1428_v18 = vor.u32 %v1575_v16, %v1425_v17  ;;  %810 = vmatpush.bf16.msrb.mxu3 %v1424_v14  ;;  %v1351_v19 = vld [vmem:[#allocation10 + $0x30] sm:$0xf]  ;;  %v1558_v20 = vld [vmem:[#allocation10 + $0x34] sm:$0xf0]  ;;  %v1328_v9 = vor.u32 %v1552_v54, %v1327_v3  ;;  %v1329_v13 = vld [vmem:[#allocation10 + $0x8] sm:$0xf0] }
 0x1dc   :  { %837 = vmatpush.bf16.msra.mxu1 %v1436_v5  ;;  %824 = vmatpush.bf16.msra.mxu0 %v1364_v15  ;;  %v1404_v5 = vor.u32 %v1569_v1, %v1401_v2  ;;  %v1392_v10 = vor.u32 %v1568_v8, %v1391_v6  ;;  %v1567_v14 = vld [vmem:[#allocation10 + $0x84] sm:$0xf]  ;;  %v1332_v16 = vor.u32 %v1551_v12, %v1329_v13  ;;  %v1393_v17 = vld [vmem:[#allocation10 + $0x88] sm:$0xf0] }
 0x1dd   :  { %v1967_v23 = vmax.f32 %v499_v22, 0.0  ;;  %v1415_v22 = vld [vmem:[#allocation10 + $0xb0] sm:$0xf] }
 0x1df   :  { %v536_v24 = vadd.f32 %v1965_v21, %v1967_v23  ;;  %v543_v27 = vmul.f32 %v1967_v23, %v1967_v23 }
 0x1e0   :  { %838 = vmatpush.bf16.msra.mxu1 %v1428_v18 }
 0x1e1   :  { %537 = vadd.xlane.f32.xlu2 %v536_v24  ;;  %v548_v29 = vadd.f32 %v544_v28, %v543_v27  ;;  %v1352_v24 = vor.u32 %v1558_v20, %v1351_v19  ;;  %v1574_v27 = vld [vmem:[#allocation10 + $0xb4] sm:$0xf0]  ;;  %v1557_v28 = vld [vmem:[#allocation10 + $0x34] sm:$0xf]  ;;  %v1396_v19 = vor.u32 %v1567_v14, %v1393_v17 }
 0x1e2   :  { %v1416_v30 = vor.u32 %v1574_v27, %v1415_v22 }
 0x1e3   :  { %549 = vadd.xlane.f32.xlu1 %v548_v29  ;;  %v1353_v29 = vld [vmem:[#allocation10 + $0x38] sm:$0xf0]  ;;  %797 = vmatpush.bf16.msrb.mxu2 %v1352_v24 }
 0x1e4   :  { %v1356_v31 = vor.u32 %v1557_v28, %v1353_v29  ;;  %811 = vmatpush.bf16.msrb.mxu3 %v1416_v30  ;;  %839 = vmatpush.bf16.msra.mxu1 %v1420_v34 }
 0x1e6   :  { %825 = vmatpush.bf16.msra.mxu0 %v1356_v31 }
 0x1e7   :  { %798 = vmatpush.bf16.msrb.mxu2 %v1344_v40 }
 0x1e8   :  { %812 = vmatpush.bf16.msrb.mxu3 %v1408_v45  ;;  %840 = vmatpush.bf16.msra.mxu1 %v1412_v50 }
 0x1ea   :  { %826 = vmatpush.bf16.msra.mxu0 %v1348_v46 }
 0x1eb   :  { %799 = vmatpush.bf16.msrb.mxu2 %v1336_v35 }
 0x1ec   :  { %813 = vmatpush.bf16.msrb.mxu3 %v1400_v36  ;;  %841 = vmatpush.bf16.msra.mxu1 %v1404_v5 }
 0x1ee   :  { %827 = vmatpush.bf16.msra.mxu0 %v1340_v0 }
 0x1ef   :  { %800 = vmatpush.bf16.msrb.mxu2 %v1328_v9 }
 0x1f0   :  { %814 = vmatpush.bf16.msrb.mxu3 %v1392_v10  ;;  %842 = vmatpush.bf16.msra.mxu1 %v1396_v19 }
 0x1f2   :  { %828 = vmatpush.bf16.msra.mxu0 %v1332_v16 }
 0x24c   :  { %v535_v44 = vpop.xlane.xlu2 %534 }
 0x24d   :  { %v1976_v49 = vmul.f32 %v535_v44, %v1927_v55 }
 0x24e   :  { %v547_v51 = vpop.xlane.xlu0 %546 }
 0x24f   :  { %v551_v57 = vmul.f32 %v547_v51, %v1927_v55  ;;  %v553_v58 = vmul.f32 %v1976_v49, %v1976_v49  ;;  %v559_v46 = vsub.f32 %v1957_v11, %v1976_v49  ;;  %v560_v47 = vsub.f32 %v1955_v7, %v1976_v49 }
 0x251   :  { %v555_v4 = vsub.f32 %v551_v57, %v553_v58 }
 0x253   :  { %v557_v15 = vmax.f32 %v555_v4, 0.0 }
 0x254   :  { %v538_v18 = vpop.xlane.xlu2 %537 }
 0x255   :  { %v563_v20 = vadd.f32 1e-05, %v557_v15  ;;  %v540_v22 = vmul.f32 %v538_v18, %v1927_v55 }
 0x256   :  { %v550_v24 = vpop.xlane.xlu1 %549 }
 0x257   :  { %1621 = vrsqrt.f32 %v563_v20  ;;  %v552_v27 = vmul.f32 %v550_v24, %v1927_v55  ;;  %v554_v28 = vmul.f32 %v540_v22, %v540_v22  ;;  %vm571_vm10 = vweird.f32 %v563_v20 }
 0x258   :  { %v561_v50 = vsub.f32 %v1967_v23, %v540_v22  ;;  %v562_v51 = vsub.f32 %v1965_v21, %v540_v22 }
 0x259   :  { %v556_v29 = vsub.f32 %v552_v27, %v554_v28  ;;  %v1590_v28 = vld [vmem:[#allocation12 + $0x38] sm:$0xff] }
 0x25a   :  { %1047 = vmatpush.bf16.msra.mxu2 %v1590_v28 }
 0x25b   :  { %v558_v30 = vmax.f32 %v556_v29, 0.0  ;;  %v1598_v29 = vld [vmem:[#allocation12 + $0x78] sm:$0xff] }
 0x25c   :  { %1061 = vmatpush.bf16.msra.mxu3 %v1598_v29 }
 0x25d   :  { %v1622_v31 = vpop.eup %1621  ;;  %v564_v33 = vadd.f32 1e-05, %v558_v30  ;;  %v1589_v30 = vld [vmem:[#allocation12 + $0x30] sm:$0xff] }
 0x25e   :  { %v566_v32 = vmul.f32 %v1622_v31, %v563_v20  ;;  %vm572_vm9 = vweird.f32 %v1622_v31  ;;  %1048 = vmatpush.bf16.msra.mxu2 %v1589_v30 }
 0x25f   :  { %1623 = vrsqrt.f32 %v564_v33  ;;  %vm573_vm11 = vmor %vm571_vm10, %vm572_vm9  ;;  %vm581_vm13 = vweird.f32 %v564_v33 }
 0x260   :  { %v567_v34 = vmul.f32 %v1622_v31, %v566_v32  ;;  %v1588_v32 = vld [vmem:[#allocation12 + $0x28] sm:$0xff] }
 0x262   :  { %v568_v37 = vmul.f32 0.5, %v567_v34  ;;  %1049 = vmatpush.bf16.msra.mxu2 %v1588_v32  ;;  %v1587_v34 = vld [vmem:[#allocation12 + $0x20] sm:$0xff] }
 0x264   :  { %v569_v38 = vsub.f32 1.5, %v568_v37  ;;  %v1595_v37 = vld [vmem:[#allocation12 + $0x60] sm:$0xff] }
 0x265   :  { %v1624_v39 = vpop.eup %1623 }
 0x266   :  { %v576_v40 = vmul.f32 %v1624_v39, %v564_v33  ;;  %v570_v41 = vmul.f32 %v1622_v31, %v569_v38  ;;  %vm582_vm12 = vweird.f32 %v1624_v39  ;;  %v1596_v33 = vld [vmem:[#allocation12 + $0x68] sm:$0xff]  ;;  %1050 = vmatpush.bf16.msra.mxu2 %v1587_v34  ;;  %v1586_v38 = vld [vmem:[#allocation12 + $0x18] sm:$0xff] }
 0x267   :  { %vm583_vm14 = vmor %vm581_vm13, %vm582_vm12 }
 0x268   :  { %v577_v42 = vmul.f32 %v1624_v39, %v576_v40  ;;  %v574_v45 = vsel %vm573_vm11, %v1622_v31, %v570_v41  ;;  %v1597_v31 = vld [vmem:[#allocation12 + $0x70] sm:$0xff] }
 0x269   :  { %v585_v52 = vmul.f32 %v574_v45, %v559_v46  ;;  %v586_v53 = vmul.f32 %v574_v45, %v560_v47  ;;  %1062 = vmatpush.bf16.msra.mxu3 %v1597_v31  ;;  %v1585_v40 = vld [vmem:[#allocation12 + $0x10] sm:$0xff]  ;;  %v1584_v47 = vld [vmem:[#allocation12 + $0x8] sm:$0xff] }
 0x26a   :  { %v578_v43 = vmul.f32 0.5, %v577_v42  ;;  %1051 = vmatpush.bf16.msra.mxu2 %v1586_v38  ;;  %v1593_v41 = vld [vmem:[#allocation12 + $0x50] sm:$0xff] }
 0x26b   :  { %v1990_v59 = vadd.f32 %v585_v52, %v1943_v60  ;;  %v1996_v7 = vadd.f32 %v586_v53, %v1947_v62  ;;  %v627_v60 = vld [vmem:[%s2053_s6] sm:$0x3]  ;;  %v1591_v52 = vld [vmem:[#allocation12 + $0x40] sm:$0xff] }
 0x26c   :  { %v579_v44 = vsub.f32 1.5, %v578_v43 }
 0x26d   :  { %1063 = vmatpush.bf16.msra.mxu3 %v1596_v33 }
 0x26e   :  { %v580_v48 = vmul.f32 %v1624_v39, %v579_v44  ;;  %1052 = vmatpush.bf16.msra.mxu2 %v1585_v40 }
 0x270   :  { %v584_v56 = vsel %vm583_vm14, %v1624_v39, %v580_v48  ;;  %v1594_v39 = vld [vmem:[#allocation12 + $0x58] sm:$0xff]  ;;  %v1592_v48 = vld [vmem:[#allocation12 + $0x48] sm:$0xff] }
 0x271   :  { %v587_v57 = vmul.f32 %v584_v56, %v561_v50  ;;  %v588_v58 = vmul.f32 %v584_v56, %v562_v51  ;;  %1064 = vmatpush.bf16.msra.mxu3 %v1595_v37  ;;  %v1583_v51 = vld [vmem:[#allocation12] sm:$0xff] }
 0x272   :  { %1053 = vmatpush.bf16.msra.mxu2 %v1584_v47 }
 0x273   :  { %v1993_v11 = vadd.f32 %v587_v57, %v1945_v61  ;;  %v1999_v49 = vadd.f32 %v588_v58, %v1949_v63  ;;  %v630_v61 = vperm.slane %v627_v60, 1  ;;  %v629_v63 = vperm.slane %v627_v60, 0 }
 0x275   :  { %v593_v21 = vpack.c.bf16 %v1993_v11, %v1990_v59  ;;  %v594_v23 = vpack.c.bf16 %v1999_v49, %v1996_v7  ;;  %1065 = vmatpush.bf16.msra.mxu3 %v1594_v39 }
 0x276   :  { %1054 = vmatpush.bf16.msra.mxu2 %v1583_v51 }
 0x277   :  { %801 = vmatmul.bf16.vlgmr.msrb.gmra.mxu2 %v593_v21  ;;  %815 = vmatmul.bf16.vlgmr.msrb.gmra.mxu3 %v594_v23 }
 0x278   :  { %829 = vmatmul.bf16.vlgmr.msra.gmra.mxu0 %v593_v21  ;;  %843 = vmatmul.bf16.vlgmr.msra.gmra.mxu1 %v594_v23 }
 0x279   :  { %1066 = vmatpush.bf16.msra.mxu3 %v1593_v41 }
 0x27d   :  { %1067 = vmatpush.bf16.msra.mxu3 %v1592_v48 }
 0x281   :  { %1068 = vmatpush.bf16.msra.mxu3 %v1591_v52 }
 0x2f5   :  { %v830_v62 = vpop.f32.mrf.mxu0  ;;  %v844_v26 = vpop.f32.mrf.mxu1 }
 0x2f6   :  { %v831_v25 = vadd.f32 %v830_v62, %v630_v61 }
 0x2f8   :  { %v845_v35 = vadd.f32 %v844_v26, %v831_v25 }
 0x2fa   :  { %v802_v36 = vpop.f32.mrf.mxu2  ;;  %v816_v0 = vpop.f32.mrf.mxu3  ;;  %v2008_v2 = vmax.f32 %v845_v35, 0.0 }
 0x2fb   :  { %v803_v1 = vadd.f32 %v802_v36, %v629_v63 }
 0x2fc   :  { %v862_v12 = vmul.f32 %v2008_v2, %v2008_v2 }
 0x2fd   :  { %v817_v3 = vadd.f32 %v816_v0, %v803_v1  ;;  %v832_v4 = vpop.f32.mrf.mxu0  ;;  %v846_v6 = vpop.f32.mrf.mxu1 }
 0x2fe   :  { %v833_v5 = vadd.f32 %v832_v4, %v630_v61 }
 0x2ff   :  { %v2010_v54 = vmax.f32 %v817_v3, 0.0 }
 0x300   :  { %v847_v8 = vadd.f32 %v846_v6, %v833_v5 }
 0x301   :  { %v853_v9 = vadd.f32 %v2008_v2, %v2010_v54  ;;  %v861_v10 = vmul.f32 %v2010_v54, %v2010_v54 }
 0x302   :  { %v804_v13 = vpop.f32.mrf.mxu2  ;;  %v818_v16 = vpop.f32.mrf.mxu3  ;;  %v2018_v17 = vmax.f32 %v847_v8, 0.0 }
 0x303   :  { %v805_v14 = vadd.f32 %v804_v13, %v629_v63  ;;  %854 = vadd.xlane.f32.xlu2 %v853_v9  ;;  %v865_v15 = vadd.f32 %v862_v12, %v861_v10 }
 0x304   :  { %v864_v24 = vmul.f32 %v2018_v17, %v2018_v17 }
 0x305   :  { %v819_v18 = vadd.f32 %v818_v16, %v805_v14  ;;  %866 = vadd.xlane.f32.xlu1 %v865_v15 }
 0x307   :  { %v2020_v19 = vmax.f32 %v819_v18, 0.0 }
 0x309   :  { %v856_v20 = vadd.f32 %v2018_v17, %v2020_v19  ;;  %v863_v22 = vmul.f32 %v2020_v19, %v2020_v19 }
 0x30b   :  { %857 = vadd.xlane.f32.xlu0 %v856_v20  ;;  %v868_v27 = vadd.f32 %v864_v24, %v863_v22 }
 0x30d   :  { %869 = vadd.xlane.f32.xlu2 %v868_v27 }
 0x376   :  { %v855_v42 = vpop.xlane.xlu2 %854 }
 0x377   :  { %v859_v43 = vmul.f32 %v855_v42, %v1927_v55 }
 0x378   :  { %v867_v44 = vpop.xlane.xlu1 %866 }
 0x379   :  { %v871_v45 = vmul.f32 %v867_v44, %v1927_v55  ;;  %v873_v46 = vmul.f32 %v859_v43, %v859_v43  ;;  %v880_v10 = vsub.f32 %v2008_v2, %v859_v43 }
 0x37b   :  { %v875_v50 = vsub.f32 %v871_v45, %v873_v46 }
 0x37d   :  { %v877_v53 = vmax.f32 %v875_v50, 0.0 }
 0x37e   :  { %v858_v56 = vpop.xlane.xlu0 %857 }
 0x37f   :  { %v883_v57 = vadd.f32 1e-05, %v877_v53  ;;  %v860_v58 = vmul.f32 %v858_v56, %v1927_v55 }
 0x380   :  { %v870_v21 = vpop.xlane.xlu2 %869 }
 0x381   :  { %1625 = vrsqrt.f32 %v883_v57  ;;  %v874_v23 = vmul.f32 %v860_v58, %v860_v58  ;;  %v872_v60 = vmul.f32 %v870_v21, %v1927_v55  ;;  %vm891_vm1 = vweird.f32 %v883_v57 }
 0x382   :  { %v879_v55 = vsub.f32 %v2010_v54, %v859_v43  ;;  %v881_v13 = vsub.f32 %v2020_v19, %v860_v58  ;;  %v882_v14 = vsub.f32 %v2018_v17, %v860_v58  ;;  %v1614_v17 = vld [vmem:[%s2055_s8] ss:$0 sm:$0xff] }
 0x383   :  { %v876_v61 = vsub.f32 %v872_v60, %v874_v23 }
 0x385   :  { %v878_v62 = vmax.f32 %v876_v61, 0.0 }
 0x387   :  { %v1626_v25 = vpop.eup %1625  ;;  %v884_v63 = vadd.f32 1e-05, %v878_v62 }
 0x388   :  { %v886_v26 = vmul.f32 %v1626_v25, %v883_v57  ;;  %vm892_vm15 = vweird.f32 %v1626_v25 }
 0x389   :  { %1627 = vrsqrt.f32 %v884_v63  ;;  %vm893_vm2 = vmor %vm891_vm1, %vm892_vm15  ;;  %vm901_vm4 = vweird.f32 %v884_v63 }
 0x38a   :  { %v887_v35 = vmul.f32 %v1626_v25, %v886_v26 }
 0x38c   :  { %v888_v36 = vmul.f32 0.5, %v887_v35 }
 0x38e   :  { %v889_v0 = vsub.f32 1.5, %v888_v36 }
 0x38f   :  { %v1628_v1 = vpop.eup %1627 }
 0x390   :  { %v896_v3 = vmul.f32 %v1628_v1, %v884_v63  ;;  %v890_v4 = vmul.f32 %v1626_v25, %v889_v0  ;;  %vm902_vm3 = vweird.f32 %v1628_v1 }
 0x391   :  { %vm903_vm5 = vmor %vm901_vm4, %vm902_vm3 }
 0x392   :  { %v897_v5 = vmul.f32 %v1628_v1, %v896_v3  ;;  %v894_v8 = vsel %vm893_vm2, %v1626_v25, %v890_v4 }
 0x393   :  { %v905_v15 = vmul.f32 %v894_v8, %v879_v55  ;;  %v906_v16 = vmul.f32 %v894_v8, %v880_v10 }
 0x394   :  { %v898_v6 = vmul.f32 0.5, %v897_v5 }
 0x395   :  { %v909_v24 = vadd.f32 %v905_v15, %v1990_v59  ;;  %v910_v54 = vadd.f32 %v906_v16, %v1996_v7 }
 0x396   :  { %v899_v9 = vsub.f32 1.5, %v898_v6 }
 0x398   :  { %v900_v12 = vmul.f32 %v1628_v1, %v899_v9 }
 0x39a   :  { %v904_v18 = vsel %vm903_vm5, %v1628_v1, %v900_v12 }
 0x39b   :  { %v907_v20 = vmul.f32 %v904_v18, %v881_v13  ;;  %v908_v22 = vmul.f32 %v904_v18, %v882_v14 }
 0x39d   :  { %v911_v27 = vadd.f32 %v907_v20, %v1993_v11  ;;  %v912_v2 = vadd.f32 %v908_v22, %v1999_v49 }
 0x39f   :  { %v913_v28 = vpack.c.bf16 %v911_v27, %v909_v24  ;;  %v914_v29 = vpack.c.bf16 %v912_v2, %v910_v54 }
 0x3a1   :  { %1055 = vmatmul.bf16.vlgmr.msra.gmra.mxu2 %v913_v28  ;;  %1069 = vmatmul.bf16.vlgmr.msra.gmra.mxu3 %v914_v29 }
 0x424   :  { %v1056_v19 = vpop.f32.mrf.mxu2  ;;  %v1070_v30 = vpop.f32.mrf.mxu3 }
 0x425   :  { %v1057_v31 = vadd.f32 %v1614_v17, %v1056_v19 }
 0x427   :  { %v1071_v32 = vadd.f32 %v1070_v30, %v1057_v31 }
 0x429   :  { %1075 = vmax.xlane.f32.xlu0 %v1071_v32 }
 0x42c   :  { %v1058_v59 = vpop.f32.mrf.mxu2  ;;  %v1072_v11 = vpop.f32.mrf.mxu3 }
 0x42d   :  { %v1059_v33 = vadd.f32 %v1614_v17, %v1058_v59 }
 0x42f   :  { %v1073_v34 = vadd.f32 %v1072_v11, %v1059_v33 }
 0x431   :  { %1077 = vmax.xlane.f32.xlu1 %v1073_v34 }
 0x49c   :  { %v1076_v7 = vpop.xlane.xlu0 %1075 }
 0x49d   :  { %v1079_v49 = vsub.f32 %v1071_v32, %v1076_v7 }
 0x49f   :  { %v1081_v37 = vmul.f32 1.442695, %v1079_v49 }
 0x4a1   :  { %1629 = vpow2.f32 %v1081_v37 }
 0x4a4   :  { %v1078_v38 = vpop.xlane.xlu1 %1077 }
 0x4a5   :  { %v1080_v39 = vsub.f32 %v1073_v34, %v1078_v38 }
 0x4a7   :  { %v1630_v40 = vpop.eup %1629  ;;  %v1083_v41 = vmul.f32 1.442695, %v1080_v39 }
 0x4a8   :  { %1085 = vadd.xlane.f32.xlu2 %v1630_v40 }
 0x4a9   :  { %1631 = vpow2.f32 %v1083_v41 }
 0x4af   :  { %v1632_v42 = vpop.eup %1631 }
 0x4b0   :  { %1087 = vadd.xlane.f32.xlu0 %v1632_v42 }
 0x51b   :  { %v1086_v43 = vpop.xlane.xlu2 %1085 }
 0x51c   :  { %1633 = vrcp.f32 %v1086_v43 }
 0x522   :  { %v1634_v44 = vpop.eup %1633 }
 0x523   :  { %v1091_v45 = vmul.f32 %v1634_v44, %v1630_v40  ;;  %v1088_v46 = vpop.xlane.xlu0 %1087 }
 0x524   :  { %1635 = vrcp.f32 %v1088_v46 }
 0x525   :  { %v1093_v47 = vpack.c.bf16 %v1091_v45, %v1091_v45 }
 0x527   :  { %v1097_v48 = vrot.slane %v1093_v47, 3 }
 0x529   :  { %v1101_v50 = vsel %vm169_vm0, %v1093_v47, %v1097_v48 }
 0x52a   :  { %v1636_v51 = vpop.eup %1635  ;;  %1134 = vst [vmem:[#allocation13] sm:$0x1] %v1101_v50 }
 0x531   :  { %v1160_v52 = vld [vmem:[#allocation13] sm:$0x1] }
 0x532   :  { %1161 = vst [vmem:[%s2056_s9] sm:$0x1] %v1160_v52 }
 0x533   :  { %1179 = vsyncpa [#allocation3], 1 }
 0x534   :  { %1180 = vsyncpa [#allocation5], 1 }
 0x535   :  { %1181 = vsyncpa [#allocation8], 1 }
 0x536   :  { %1182 = vsyncpa [#allocation11], 1 }

</bundles_post_ra>
